<compile_context>
chip_gen: v7x
topology: tpu7x:2x2x1
jax: 0.10.0
libtpu: 0.0.40
codegen_flags: <defaults>
</compile_context>

<pallas_src>
import math
from functools import partial

import jax
import jax.numpy as jnp
from jax.experimental import pallas as pl
from jax.experimental.pallas import tpu as pltpu

VMEM_SPEC = pl.BlockSpec(memory_space=pltpu.MemorySpace.VMEM)
SMEM_SPEC = pl.BlockSpec(memory_space=pltpu.MemorySpace.SMEM)


def _round_up(n, m):
    return ((n + m - 1) // m) * m


# ---------------- kernel 1 (optional/debug): sum(x*y)/sqrt(H*W) --------------
def _weighted_sum_kernel(x_ref, y_ref, out_ref, acc_ref, *, inv_sqrt_hw):
    i, j = pl.program_id(0), pl.program_id(1)

    @pl.when((i == 0) & (j == 0))
    def _():
        acc_ref[...] = jnp.zeros_like(acc_ref)

    # Cast in-kernel (VPU slack is free); accumulate in f32.
    prod = x_ref[...].astype(jnp.float32) * y_ref[...].astype(jnp.float32)
    tbc, thw = prod.shape
    # Fold row groups with pure VPU vreg adds (aligned static slices, no
    # relayout); the single cross-lane XLU reduce is deferred to the last step.
    tile_sum = prod[0:8, :]
    for r in range(8, tbc, 8):
        tile_sum = tile_sum + prod[r:r + 8, :]
    acc_ref[...] += tile_sum

    @pl.when((i == pl.num_programs(0) - 1) & (j == pl.num_programs(1) - 1))
    def _():
        out_ref[0] = jnp.sum(acc_ref[...]) * inv_sqrt_hw


def weighted_sum(x2d, y2d, inv_sqrt_hw, *, target_block_elems=512 * 1024):
    """Grid-tiled full reduction sum(x*y) * inv_sqrt_hw.

    Blocks are kept at ~2 MiB f32 per input so 2 inputs x 2 pipeline buffers
    fit comfortably under the 16/32/32 MiB scoped-VMEM defaults (v5e/v6e/v7x).
    """
    assert x2d.shape == y2d.shape and x2d.ndim == 2
    BC, HW = x2d.shape
    tbc = min(_round_up(BC, 8), 256)
    thw = min(_round_up(HW, 128),
              max(128, (target_block_elems // tbc) // 128 * 128))
    PBC, PHW = _round_up(BC, tbc), _round_up(HW, thw)
    if (PBC, PHW) != (BC, HW):  # zero-pad: zeros do not change the sum
        x2d = jnp.pad(x2d, ((0, PBC - BC), (0, PHW - HW)))
        y2d = jnp.pad(y2d, ((0, PBC - BC), (0, PHW - HW)))
    grid = (PBC // tbc, PHW // thw)
    nbytes = x2d.size * x2d.dtype.itemsize + y2d.size * y2d.dtype.itemsize
    out = pl.pallas_call(
        partial(_weighted_sum_kernel, inv_sqrt_hw=float(inv_sqrt_hw)),
        out_shape=jax.ShapeDtypeStruct((1,), jnp.float32),
        grid=grid,
        in_specs=[pl.BlockSpec((tbc, thw), lambda i, j: (i, j)),
                  pl.BlockSpec((tbc, thw), lambda i, j: (i, j))],
        out_specs=SMEM_SPEC,
        scratch_shapes=[pltpu.VMEM((8, thw), jnp.float32)],
        compiler_params=pltpu.CompilerParams(
            dimension_semantics=("arbitrary", "arbitrary"),
            vmem_limit_bytes=32 * 1024 * 1024),
        cost_estimate=pl.CostEstimate(flops=2 * x2d.size, transcendentals=0,
                                      bytes_accessed=nbytes + 4),
    )(x2d, y2d)
    return out[0]


# ----------- kernel 2: per-sample grad norm + EMA path-length penalty --------
def _norm_loss_kernel(scalars_ref, g_ref, out_ref, *, inv_n_layers, scale):
    # scalars_ref: SMEM (2,) = [a, steps>0 flag]; g_ref: VMEM (B, L*D) raw grads
    g = g_ref[...].astype(jnp.float32)
    # norm_b = (1/sqrt(HW)) * sqrt( sum_{L,D} g_raw^2 / L )
    norm = jnp.sqrt(jnp.sum(g * g, axis=1, keepdims=True) * inv_n_layers) * scale
    a = scalars_ref[0]
    steps_pos = scalars_ref[1]
    loss = jnp.mean((norm - a) ** 2)
    out_ref[0] = jnp.where(steps_pos > 0.0, loss, jnp.float32(0.0))
    out_ref[1] = jnp.mean(norm)


def norm_and_loss(grads_flat, n_layers, inv_sqrt_hw, a, steps_pos):
    B, LD = grads_flat.shape
    scalars = jnp.stack([jnp.asarray(a, dtype=jnp.float32),
                         jnp.asarray(steps_pos, dtype=jnp.float32)])
    nbytes = grads_flat.size * grads_flat.dtype.itemsize
    out = pl.pallas_call(
        partial(_norm_loss_kernel,
                inv_n_layers=1.0 / float(n_layers),
                scale=float(inv_sqrt_hw)),
        out_shape=jax.ShapeDtypeStruct((2,), jnp.float32),
        in_specs=[SMEM_SPEC, VMEM_SPEC],
        out_specs=SMEM_SPEC,
        compiler_params=pltpu.CompilerParams(vmem_limit_bytes=32 * 1024 * 1024),
        cost_estimate=pl.CostEstimate(flops=4 * B * LD, transcendentals=B,
                                      bytes_accessed=nbytes + 16),
    )(scalars, grads_flat)
    return out[0], out[1]


# ------------------------------- module port ---------------------------------
class PathLengthPenalty:
    """JAX/Pallas port of the PyTorch PathLengthPenalty module.

    Non-trainable buffers (steps, exp_sum_a) are held on the object and
    updated in __call__, mirroring the in-place buffer updates of torch.
    """

    def __init__(self, beta: float):
        self.beta = float(beta)
        self.steps = 0                       # exact integer step counter
        self.exp_sum_a = jnp.float32(0.0)

    def __call__(self, w, generator_fn, key, compute_output: bool = False):
        # TODO(synk): torch.autograd.grad through the caller's generator graph
        # has no Pallas equivalent; it is reproduced with jax.vjp of the
        # supplied generator_fn (plain XLA).
        x, vjp_fn = jax.vjp(generator_fn, w)
        B, C, H, W = x.shape
        inv_sqrt_hw = 1.0 / math.sqrt(float(H * W))

        y = jax.random.normal(key, x.shape, dtype=x.dtype)

        # The torch scalar `output` only exists to seed autograd; its value
        # never reaches the loss, so by default we skip it (perf review).
        if compute_output:
            _ = weighted_sum(x.reshape(B * C, H * W),
                             y.reshape(B * C, H * W), inv_sqrt_hw)

        # d output / d w == vjp of the generator with cotangent y * inv_sqrt_hw.
        # By linearity, pass y unscaled and fold the scale into the tiny norm
        # kernel (saves a full read+write of the image-sized y).
        (grads,) = vjp_fn(y)
        Bw, L, D = grads.shape

        if self.steps > 0:
            a = self.exp_sum_a / (1.0 - self.beta ** self.steps)
            steps_pos = 1.0
        else:
            a = jnp.float32(0.0)
            steps_pos = 0.0

        loss, mean_norm = norm_and_loss(
            grads.reshape(Bw, L * D), L, inv_sqrt_hw, a, steps_pos)

        # mirror: exp_sum_a.mul_(beta).add_(mean, alpha=1-beta); steps += 1
        self.exp_sum_a = self.exp_sum_a * self.beta + mean_norm * (1.0 - self.beta)
        self.steps += 1
        return loss


if __name__ == "__main__":
    B, C, H, W = 2, 4, 16, 16       # image batch (NCHW)
    L, D = 8, 32                    # w: (batch, generator blocks, d_latent)

    root = jax.random.PRNGKey(0)
    k_w, k_gen, k_y1, k_y2, k_ws = jax.random.split(root, 5)

    # Deterministic synthetic generator (glue, not part of the module).
    G = jax.random.normal(k_gen, (L * D, C * H * W), dtype=jnp.float32) * 0.02

    def generator_fn(w):
        flat = w.reshape(w.shape[0], L * D) @ G
        return flat.reshape(w.shape[0], C, H, W)

    w = jax.random.normal(k_w, (B, L, D), dtype=jnp.float32)

    plp = PathLengthPenalty(beta=0.99)
    loss0 = plp(w, generator_fn, k_y1)      # steps == 0 path -> loss 0
    loss1 = plp(w, generator_fn, k_y2)      # steps > 0 path -> EMA penalty
    jax.block_until_ready((loss0, loss1))
    assert jnp.isfinite(loss0) and jnp.isfinite(loss1)

    # ---- pure-JAX reference of the same two steps (torch semantics) ----
    def ref_step(w_, key, beta, steps, exp_sum_a):
        x_, vjp_fn_ = jax.vjp(generator_fn, w_)
        hw = x_.shape[2] * x_.shape[3]
        y_ = jax.random.normal(key, x_.shape, dtype=x_.dtype)
        (g_,) = vjp_fn_((y_ / math.sqrt(hw)).astype(x_.dtype))
        norm = jnp.sqrt((g_.astype(jnp.float32) ** 2).sum(axis=2).mean(axis=1))
        if steps > 0:
            a_ = exp_sum_a / (1.0 - beta ** steps)
            loss_ = jnp.mean((norm - a_) ** 2)
        else:
            loss_ = jnp.float32(0.0)
        exp_sum_a = exp_sum_a * beta + float(norm.mean()) * (1.0 - beta)
        return loss_, exp_sum_a, steps + 1

    r_loss0, r_exp, r_steps = ref_step(w, k_y1, 0.99, 0, 0.0)
    r_loss1, r_exp, r_steps = ref_step(w, k_y2, 0.99, r_steps, r_exp)
    assert jnp.allclose(loss0, r_loss0, rtol=1e-3, atol=1e-7), (loss0, r_loss0)
    assert jnp.allclose(loss1, r_loss1, rtol=1e-3, atol=1e-7), (loss1, r_loss1)

    # ---- exercise the optional tiled weighted_sum kernel once ----
    x = generator_fn(w)
    y = jax.random.normal(k_ws, x.shape, dtype=x.dtype)
    got = weighted_sum(x.reshape(B * C, H * W), y.reshape(B * C, H * W),
                       1.0 / math.sqrt(H * W))
    want = jnp.sum(x * y) / math.sqrt(H * W)
    jax.block_until_ready(got)
    assert jnp.allclose(got, want, rtol=1e-4, atol=1e-3), (got, want)

    print("KERNEL_OK")
</pallas_src>

<mosaic_0001>
module attributes {stable_mosaic.version = 11 : i64} {
  func.func @_norm_loss_kernel(%arg0: memref<2xf32, #tpu.memory_space<smem>>, %arg1: memref<2x256xf32, #tpu.memory_space<vmem>>, %arg2: memref<2xf32, #tpu.memory_space<smem>>) attributes {dimension_semantics = [], scalar_prefetch = 0 : i64, scratch_operands = 0 : i64, tpu.core_type = #tpu.core_type<tc>} {
    %c0 = arith.constant 0 : index
    %c0_0 = arith.constant 0 : index
    %0 = vector.load %arg1[%c0, %c0_0] : memref<2x256xf32, #tpu.memory_space<vmem>>, vector<2x256xf32>
    %1 = arith.mulf %0, %0 : vector<2x256xf32>
    %cst = arith.constant dense<0.000000e+00> : vector<2xf32>
    %2 = vector.multi_reduction <add>, %1, %cst [1] : vector<2x256xf32> to vector<2xf32>
    %3 = vector.shape_cast %2 : vector<2xf32> to vector<2x1xf32>
    %cst_1 = arith.constant 1.250000e-01 : f32
    %4 = vector.broadcast %cst_1 : f32 to vector<2x1xf32>
    %5 = arith.mulf %3, %4 : vector<2x1xf32>
    %6 = math.sqrt %5 : vector<2x1xf32>
    %cst_2 = arith.constant 6.250000e-02 : f32
    %7 = vector.broadcast %cst_2 : f32 to vector<2x1xf32>
    %8 = arith.mulf %6, %7 : vector<2x1xf32>
    %c0_3 = arith.constant 0 : index
    %9 = memref.load %arg0[%c0_3] : memref<2xf32, #tpu.memory_space<smem>>
    %c1 = arith.constant 1 : index
    %10 = memref.load %arg0[%c1] : memref<2xf32, #tpu.memory_space<smem>>
    %11 = vector.broadcast %9 : f32 to vector<2x1xf32>
    %12 = arith.subf %8, %11 : vector<2x1xf32>
    %13 = arith.mulf %12, %12 : vector<2x1xf32>
    %14 = vector.shape_cast %13 : vector<2x1xf32> to vector<1x2x1xf32>
    %cst_4 = arith.constant dense<0.000000e+00> : vector<1xf32>
    %15 = vector.multi_reduction <add>, %14, %cst_4 [1, 2] : vector<1x2x1xf32> to vector<1xf32>
    %16 = vector.shape_cast %15 : vector<1xf32> to vector<1x1x1xf32>
    %17 = vector.extract %16[0, 0, 0] : f32 from vector<1x1x1xf32>
    %cst_5 = arith.constant 2.000000e+00 : f32
    %18 = arith.divf %17, %cst_5 : f32
    %cst_6 = arith.constant 0.000000e+00 : f32
    %19 = arith.cmpf ogt, %10, %cst_6 : f32
    %cst_7 = arith.constant 0.000000e+00 : f32
    %20 = arith.select %19, %18, %cst_7 : f32
    %c0_8 = arith.constant 0 : index
    %21 = memref.load %arg2[%c0_8] : memref<2xf32, #tpu.memory_space<smem>>
    memref.store %20, %arg2[%c0_8] : memref<2xf32, #tpu.memory_space<smem>>
    %22 = vector.shape_cast %8 : vector<2x1xf32> to vector<1x2x1xf32>
    %cst_9 = arith.constant dense<0.000000e+00> : vector<1xf32>
    %23 = vector.multi_reduction <add>, %22, %cst_9 [1, 2] : vector<1x2x1xf32> to vector<1xf32>
    %24 = vector.shape_cast %23 : vector<1xf32> to vector<1x1x1xf32>
    %25 = vector.extract %24[0, 0, 0] : f32 from vector<1x1x1xf32>
    %cst_10 = arith.constant 2.000000e+00 : f32
    %26 = arith.divf %25, %cst_10 : f32
    %c1_11 = arith.constant 1 : index
    %27 = memref.load %arg2[%c1_11] : memref<2xf32, #tpu.memory_space<smem>>
    memref.store %26, %arg2[%c1_11] : memref<2xf32, #tpu.memory_space<smem>>
    return
  }
}

</mosaic_0001>

<bundles_post_ra>
// kernel: tpu_custom_call.1
= control target key start
LH: loop header
LB: loop body
LE: loop exit
PB: predicated region body
PF: predicated region fallthrough
CT: control target
= control target key end

     0   :  { %7 = vsyncpa [#allocation4], 0  ;;  %s230_s0 = inlined_call_operand.hbm [shape: f32[2], index: 0, kind: input, shape index: {}]   ;;  %s231_s1 = inlined_call_operand.hbm [shape: f32[2,256], index: 1, kind: input, shape index: {}]   ;;  %s232_s2 = inlined_call_operand.hbm [shape: f32[2], index: 2, kind: output, shape index: {}]  }
   0x1   :  { %8 = vsyncpa [#allocation3], 0 }
   0x2   :  { %9 = vsyncpa [#allocation5], 0  ;;  %s127_s11 = scalar_lea.hbm %s230_s0, 16 }
   0x3   :  { %p128_p0 = scmp.ne.s32.totalorder %s230_s0, %s127_s11  ;;  %p131_p1 = scmp.lt.u32.totalorder %s127_s11, %s230_s0 }
   0x5   :  { %p133_p2 = pnand %p131_p1, %p128_p0 }
   0x7   :  { %136 = shalt.err (!%p133_p2)
}
   0x8   :  { %s175_s16 = smov [#allocation2]   ;;  %s176_s19 = smov [#allocation6]  }
   0x9   :  { %17 = dma.hbm_to_smem %s230_s0, 16, %s175_s16, [#allocation4]  }
   0xa   :  { %s24_s20 = sshll.u32 %s176_s19, 4  ;;  %s137_s23 = scalar_lea.hbm %s231_s1, 64  ;;  %s25_s20 = int_to_ptr.vmem [resolvable:$true] %s24_s20 }
   0xb   :  { %p138_p3 = scmp.ne.s32.totalorder %s231_s1, %s137_s23  ;;  %p141_p4 = scmp.lt.u32.totalorder %s137_s23, %s231_s1 }
   0xd   :  { %p143_p5 = pnand %p141_p4, %p138_p3 }
   0xf   :  { %146 = shalt.err (!%p143_p5)
}
  0x10   :  { %s147_s28 = scalar_lea.vmem %s25_s20, 64  ;;  %p152_p7 = scmp.lt.s32.totalorder %s25_s20, %s25_s20 }
  0x11   :  { %p148_p6 = scmp.ne.s32.totalorder %s25_s20, %s147_s28  ;;  %p153_p8 = scmp.lt.s32.totalorder %s147_s28, %s147_s28 }
  0x13   :  { %p154_p9 = por %p153_p8, %p152_p7 }
  0x15   :  { %p155_p10 = pnand %p154_p9, %p148_p6 }
  0x17   :  { %158 = shalt.err (!%p155_p10)
}
  0x18   :  { %27 = dma.hbm_to_vmem [thread:$0]  %s231_s1, 64, %s25_s20, [#allocation3]  }
  0x19   :  { %169 = dma.done.wait [#allocation4], 16  }
  0x1a   :  { %170 = vsyncadd [#allocation4], 4294967280 }
  0x1b   :  { %171 = dma.done.wait [#allocation3], 64  }
  0x1c   :  { %172 = vsyncadd [#allocation3], 4294967232 }
  0x1d   :  { %34 = sfence }
  0x1e   :  { %v35_v0 = vld [vmem:[#allocation6] sm:$0xf]  ;;  %v41_v1 = vlaneseq  ;;  %v177_v2 = vmov 1983009808   ;;  %vm48_vm0 = vcmask 1041408   ;;  %s63_s1 = sld [smem:[#allocation2]] }
  0x1f   :  { %v39_v3 = vunpack.c.l.s4 %v177_v2  ;;  %v36_v5 = vmul.f32 %v35_v0, %v35_v0  ;;  %vm68_vm3 = vcmask 1024   ;;  %s116_s30 = sld [smem:[#allocation2 + $0x1]]  ;;  %s159_s9 = scalar_lea.hbm %s232_s2, 16 }
  0x20   :  { %v42_v4 = vshrl.u32 %v41_v1, 7  ;;  %p160_p12 = scmp.ne.s32.totalorder %s232_s2, %s159_s9  ;;  %p163_p13 = scmp.lt.u32.totalorder %s159_s9, %s232_s2 }
  0x21   :  { %v40_v6 = vunpack.c.0.s8 %v39_v3 }
  0x22   :  { %p165_p0 = pnand %p163_p13, %p160_p12 }
  0x23   :  { %v43_v7 = vsub.s32 %v40_v6, %v42_v4 }
  0x24   :  { %v65_v20 = vstv %s63_s1 }
  0x25   :  { %v44_v8 = vrot.slane %v36_v5, %v43_v7  ;;  %p82_p11 = scmp.gt.f32.partialorder %s116_s30, 0.0 }
  0x27   :  { %v45_v9 = vcombine.high %v44_v8, %v44_v8  ;;  %v49_v10 = vsel %vm48_vm0, %v44_v8, 0.0 }
  0x29   :  { %v50_v11 = vsel %vm48_vm0, %v45_v9, 0.0 }
  0x2a   :  { %v51_v12 = vadd.f32 %v50_v11, %v49_v10 }
  0x2c   :  { %52 = vadd.xlane.f32.xlu0 %v51_v12 }
  0xb9   :  { %v53_v13 = vpop.xlane.xlu0 %52 }
  0xba   :  { %v54_v14 = vmul.f32 0.125, %v53_v13 }
  0xbc   :  { %125 = vrsqrt.f32 %v54_v14  ;;  %vm57_vm1 = vcmp.eq.f32.partialorder %v54_v14, inf  ;;  %v60_v17 = vand.u32 2147483648, %v54_v14  ;;  %vm59_vm2 = vcmp.eq.f32.partialorder %v54_v14, 0.0 }
  0xc6   :  { %v126_v15 = vpop.eup %125 }
  0xc7   :  { %v56_v16 = vmul.f32 %v126_v15, %v54_v14 }
  0xc9   :  { %v58_v18 = vsel %vm57_vm1, %v54_v14, %v56_v16 }
  0xca   :  { %v61_v19 = vsel %vm59_vm2, %v60_v17, %v58_v18 }
  0xcb   :  { %v62_v21 = vmul.f32 0.0625, %v61_v19 }
  0xcd   :  { %v86_v22 = vsel %vm68_vm3, %v62_v21, 0.0  ;;  %v66_v23 = vsub.f32 %v62_v21, %v65_v20 }
  0xce   :  { %87 = vadd.xlane.f32.xlu1 %v86_v22 }
  0xcf   :  { %v67_v24 = vmul.f32 %v66_v23, %v66_v23 }
  0xd1   :  { %v69_v25 = vsel %vm68_vm3, %v67_v24, 0.0 }
  0xd2   :  { %70 = vadd.xlane.f32.xlu0 %v69_v25 }
 0x15b   :  { %v88_v26 = vpop.xlane.xlu1 %87 }
 0x15c   :  { %v89_v27 = vrot.slane %v88_v26, 4 }
 0x15e   :  { %v90_v28 = vadd.f32 %v89_v27, %v88_v26 }
 0x15f   :  { %v71_v29 = vpop.xlane.xlu0 %70 }
 0x160   :  { %v91_v30 = vrot.slane %v90_v28, 2  ;;  %v72_v31 = vrot.slane %v71_v29, 4 }
 0x162   :  { %v73_v32 = vadd.f32 %v72_v31, %v71_v29  ;;  %v92_v33 = vadd.f32 %v91_v30, %v90_v28 }
 0x164   :  { %v74_v34 = vrot.slane %v73_v32, 2  ;;  %v93_v36 = vrot.slane %v92_v33, 1 }
 0x166   :  { %v75_v35 = vadd.f32 %v74_v34, %v73_v32  ;;  %v94_v39 = vadd.f32 %v93_v36, %v92_v33 }
 0x168   :  { %v76_v37 = vrot.slane %v75_v35, 1 }
 0x16a   :  { %v77_v38 = vadd.f32 %v76_v37, %v75_v35 }
 0x16c   :  { %117 = vpush %v77_v38 }
 0x16d   :  { %119 = vpush %v94_v39 }
 0x19d   :  { %s118_s3 = spop %117 }
 0x19e   :  { %s81_s4 = smul.f32 0.5, %s118_s3  ;;  %s120_s5 = spop %119 }
 0x19f   :  { %s98_s6 = smul.f32 0.5, %s120_s5 }
 0x1a0   :  { %s234_s4 = smov (!%p82_p11, %s81_s4), 0.0 }
 0x1a1   :  { %100 = sst [smem:[#allocation7 + $0x1]] %s98_s6 }
 0x1a2   :  { %85 = sst [smem:[#allocation7]] %s234_s4 }
 0x1a3   :  { %168 = shalt.err (!%p165_p0)
}
 0x1a4   :  { %s178_s14 = smov [#allocation7]  }
 0x1a5   :  { %108 = dma.smem_to_hbm %s178_s14, 16, %s232_s2, [#allocation5]  }
 0x1a6   :  { %173 = dma.done.wait [#allocation5], 16  }
 0x1a7   :  { %174 = vsyncadd [#allocation5], 4294967280 }
 0x1a8   :  { %112 = sfence }
 0x1a9   :  { %113 = vsyncpa [#allocation3], 1 }
 0x1aa   :  { %114 = vsyncpa [#allocation4], 1 }
 0x1ab   :  { %115 = vsyncpa [#allocation5], 1 }

</bundles_post_ra>
